<compile_context>
chip_gen: v5e
topology: v5e:2x2
jax: 0.10.0
libtpu: 0.0.40
codegen_flags: <defaults>
</compile_context>

<pallas_src>
import functools
import math

import jax
import jax.numpy as jnp
from jax import lax
from jax.experimental import pallas as pl
from jax.experimental.pallas import tpu as pltpu


# Scoped-VMEM limit for every pallas_call: above the 16/32 MiB v5e/v6e
# defaults, below v7x's 64 MiB physical VMEM.
_VMEM_LIMIT_BYTES = 48 * 1024 * 1024

_NEG_INF = -1e30   # finite "-inf" init for the online-softmax running max
_MASK_NEG = -1e9   # matches torch masked_fill(mask == 0, -1e9) convention


# ----------------------------- helpers ------------------------------------- #

def _sublane_align(dtype) -> int:
    """Native second-minor (sublane) tile multiple for a dtype."""
    return {4: 8, 2: 16, 1: 32}.get(jnp.dtype(dtype).itemsize, 8)


def _pick_tile(dim: int, target: int, align: int) -> int:
    """Largest tile <= target that divides `dim` and respects alignment.

    Falls back to the full extent (always a legal BlockSpec block).
    """
    if dim <= target:
        return dim
    t = (target // align) * align
    while t >= align:
        if dim % t == 0:
            return t
        t -= align
    return dim


# ------------------------- stacked linear kernels --------------------------- #

def _stacked_linear_kernel_noacc(x_ref, w_ref, b_ref, o_ref):
    """y[g] = x @ w[g] + b[g]; whole contraction in one block (2-D grid)."""
    x = x_ref[...]
    for g in range(o_ref.shape[0]):
        acc = jnp.dot(x, w_ref[g], preferred_element_type=jnp.float32)
        o_ref[g] = (acc + b_ref[g].astype(jnp.float32)).astype(o_ref.dtype)


def _stacked_linear_kernel_ksplit(x_ref, w_ref, b_ref, o_ref, acc_ref):
    """y[g] = x @ w[g] + b[g]; K tiled on grid axis 2, f32 VMEM accumulator."""
    k = pl.program_id(2)

    @pl.when(k == 0)
    def _():
        acc_ref[...] = jnp.zeros_like(acc_ref)

    x = x_ref[...]
    for g in range(o_ref.shape[0]):
        acc_ref[g] += jnp.dot(x, w_ref[g], preferred_element_type=jnp.float32)

    @pl.when(k == pl.num_programs(2) - 1)
    def _():
        o_ref[...] = (acc_ref[...]
                      + b_ref[...].astype(jnp.float32)).astype(o_ref.dtype)


def stacked_linear(x, w, b, *, tm_target=512, tn_target=512, tk_target=2048,
                   out_dtype=None):
    """x: (M, K); w: (G, K, N) pre-transposed (in, out); b: (G, 1, N) f32.

    Returns (G, M, N) with out[g] = x @ w[g] + b[g].
    """
    M, K = x.shape
    G, Kw, N = w.shape
    assert K == Kw and b.shape == (G, 1, N)
    out_dtype = x.dtype if out_dtype is None else out_dtype

    tm = _pick_tile(M, tm_target, _sublane_align(x.dtype))
    tn = _pick_tile(N, tn_target, 128)
    tk = _pick_tile(K, tk_target, 128)
    nm, nn, nk = M // tm, N // tn, K // tk

    if nk == 1:
        # Whole-K block: 2-D grid, no accumulator scratch, no init/finalize.
        grid = (nm, nn)
        kernel = _stacked_linear_kernel_noacc
        in_specs = [
            pl.BlockSpec((tm, K), lambda i, j: (i, 0)),
            pl.BlockSpec((G, K, tn), lambda i, j: (0, 0, j)),
            pl.BlockSpec((G, 1, tn), lambda i, j: (0, 0, j)),
        ]
        out_specs = pl.BlockSpec((G, tm, tn), lambda i, j: (0, i, j))
        scratch_shapes = []
        semantics = ("parallel", "parallel")
    else:
        grid = (nm, nn, nk)
        kernel = _stacked_linear_kernel_ksplit
        in_specs = [
            pl.BlockSpec((tm, tk), lambda i, j, k: (i, k)),
            pl.BlockSpec((G, tk, tn), lambda i, j, k: (0, k, j)),
            pl.BlockSpec((G, 1, tn), lambda i, j, k: (0, 0, j)),
        ]
        out_specs = pl.BlockSpec((G, tm, tn), lambda i, j, k: (0, i, j))
        scratch_shapes = [pltpu.VMEM((G, tm, tn), jnp.float32)]
        semantics = ("parallel", "parallel", "arbitrary")

    return pl.pallas_call(
        kernel,
        out_shape=jax.ShapeDtypeStruct((G, M, N), out_dtype),
        grid_spec=pltpu.PrefetchScalarGridSpec(
            num_scalar_prefetch=0,
            grid=grid,
            in_specs=in_specs,
            out_specs=out_specs,
            scratch_shapes=scratch_shapes),
        compiler_params=pltpu.CompilerParams(
            dimension_semantics=semantics,
            vmem_limit_bytes=_VMEM_LIMIT_BYTES),
    )(x, w, b)


# ----------------- flash attention + fused output projection ---------------- #

def _flash_mha_kernel(num_heads, mask_mode, *refs):
    """One (batch, q-tile, kv-tile) grid step.

    q_ref/k_ref/v_ref: (1, 1, tq|tk, E) views into the (3, B, S, E) qkv slab.
    wout_ref: (E, E) pre-transposed output-projection weight; bout_ref: (1, E).
    mask_ref (mask_mode == "array"): (1, tq, tk) int8 keep-mask.
    o_ref: (1, tq, E).  Scratch: m/l (H, tq, 1) f32, acc (H, tq, Dh) f32.
    """
    if mask_mode == "array":
        (q_ref, k_ref, v_ref, wout_ref, bout_ref, mask_ref,
         o_ref, m_scr, l_scr, acc_scr) = refs
    else:
        (q_ref, k_ref, v_ref, wout_ref, bout_ref,
         o_ref, m_scr, l_scr, acc_scr) = refs
        mask_ref = None

    H = num_heads
    tq = q_ref.shape[2]
    tk = k_ref.shape[2]
    E = q_ref.shape[3]
    Dh = E // H
    ki = pl.program_id(2)

    @pl.when(ki == 0)
    def _():
        m_scr[...] = jnp.full_like(m_scr, _NEG_INF)
        l_scr[...] = jnp.zeros_like(l_scr)
        acc_scr[...] = jnp.zeros_like(acc_scr)

    # Additive mask bias built once per (q-tile, kv-tile) step, hoisted out of
    # the per-head loop.  Causal mask costs zero HBM bytes (iota in-kernel).
    if mask_mode == "causal":
        qi = pl.program_id(1)
        row = qi * tq + lax.broadcasted_iota(jnp.int32, (tq, tk), 0)
        col = ki * tk + lax.broadcasted_iota(jnp.int32, (tq, tk), 1)
        bias = jnp.where(row >= col, 0.0, _MASK_NEG).astype(jnp.float32)
    elif mask_mode == "array":
        bias = jnp.where(mask_ref[0] != 0, 0.0, _MASK_NEG).astype(jnp.float32)
    else:
        bias = None

    # Online-softmax update per head (unrolled; H is small and static).
    for h in range(H):
        q = q_ref[0, 0, :, pl.ds(h * Dh, Dh)]           # (tq, Dh) native dtype
        k = k_ref[0, 0, :, pl.ds(h * Dh, Dh)]           # (tk, Dh)
        v = v_ref[0, 0, :, pl.ds(h * Dh, Dh)]           # (tk, Dh)

        # scores = Q @ K^T (1/sqrt(Dh) already folded into the Q projection).
        s = lax.dot_general(q, k, (((1,), (1,)), ((), ())),
                            preferred_element_type=jnp.float32)   # (tq, tk)
        if bias is not None:
            s = s + bias

        m_prev = m_scr[h]                                          # (tq, 1)
        m_new = jnp.maximum(m_prev, jnp.max(s, axis=-1, keepdims=True))
        alpha = jnp.exp(m_prev - m_new)
        p = jnp.exp(s - m_new)
        l_scr[h] = alpha * l_scr[h] + jnp.sum(p, axis=-1, keepdims=True)
        acc_scr[h] = alpha * acc_scr[h] + jnp.dot(
            p.astype(v.dtype), v, preferred_element_type=jnp.float32)
        m_scr[h] = m_new

    # Last kv step: normalize each head and apply the fused output projection.
    @pl.when(ki == pl.num_programs(2) - 1)
    def _():
        total = bout_ref[...].astype(jnp.float32)        # (1, E) -> broadcasts
        for h in range(H):
            ctx = acc_scr[h] * pl.reciprocal(l_scr[h], approx=True)  # (tq, Dh)
            total = total + jnp.dot(
                ctx.astype(wout_ref.dtype), wout_ref[pl.ds(h * Dh, Dh), :],
                preferred_element_type=jnp.float32)
        o_ref[0] = total.astype(o_ref.dtype)             # lane-dense (tq, E)


def pallas_flash_mha(qkv, w_out_t, b_out, mask, num_heads, *,
                     tq_target=256, tk_target=256, out_dtype=None):
    """qkv: (3, B, S, E) stacked Q/K/V projections.  mask: None | "causal" |
    (B, S, S) array (nonzero = keep).  Returns softmax(QK^T)V @ W_out + b_out.
    """
    three, B, S, E = qkv.shape
    assert three == 3 and E % num_heads == 0
    Dh = E // num_heads
    out_dtype = qkv.dtype if out_dtype is None else out_dtype

    align = _sublane_align(qkv.dtype)
    tq = _pick_tile(S, tq_target, align)
    tk = _pick_tile(S, tk_target, align)
    grid = (B, S // tq, S // tk)   # (parallel, parallel, arbitrary)

    in_specs = [
        pl.BlockSpec((1, 1, tq, E), lambda b, qi, ki: (0, b, qi, 0)),  # Q rows
        pl.BlockSpec((1, 1, tk, E), lambda b, qi, ki: (1, b, ki, 0)),  # K rows
        pl.BlockSpec((1, 1, tk, E), lambda b, qi, ki: (2, b, ki, 0)),  # V rows
        pl.BlockSpec((E, E), lambda b, qi, ki: (0, 0)),                # W_out
        pl.BlockSpec((1, E), lambda b, qi, ki: (0, 0)),                # b_out
    ]
    args = [qkv, qkv, qkv, w_out_t, b_out.reshape(1, E)]

    if mask is None:
        mask_mode = "none"
    elif isinstance(mask, str):
        assert mask == "causal"
        mask_mode = "causal"
    else:
        mask_mode = "array"
        in_specs.append(pl.BlockSpec((1, tq, tk), lambda b, qi, ki: (b, qi, ki)))
        args.append((mask != 0).astype(jnp.int8))   # 4x smaller than f32 masks

    kernel = functools.partial(_flash_mha_kernel, num_heads, mask_mode)
    return pl.pallas_call(
        kernel,
        out_shape=jax.ShapeDtypeStruct((B, S, E), out_dtype),
        grid_spec=pltpu.PrefetchScalarGridSpec(
            num_scalar_prefetch=0,
            grid=grid,
            in_specs=in_specs,
            out_specs=pl.BlockSpec((1, tq, E), lambda b, qi, ki: (b, qi, 0)),
            scratch_shapes=[
                pltpu.VMEM((num_heads, tq, 1), jnp.float32),   # running max
                pltpu.VMEM((num_heads, tq, 1), jnp.float32),   # running sum
                pltpu.VMEM((num_heads, tq, Dh), jnp.float32),  # running context
            ]),
        compiler_params=pltpu.CompilerParams(
            dimension_semantics=("parallel", "parallel", "arbitrary"),
            vmem_limit_bytes=_VMEM_LIMIT_BYTES),
    )(*args)


# --------------------------------- module ----------------------------------- #

class SelfAttention:
    """JAX/Pallas port of the PyTorch SelfAttention module (eval mode)."""

    def __init__(self, embed_size, num_heads, dropout=0.1,
                 local_attention_window=None, use_low_rank_approx=False,
                 param_dtype=jnp.bfloat16, rng_key=None):
        assert embed_size % num_heads == 0, "embed_size must divide num_heads"
        self.embed_size = embed_size
        self.num_heads = num_heads
        self.head_dim = embed_size // num_heads
        self.dropout = dropout          # TODO(synk): eval-mode identity.
        self.param_dtype = param_dtype
        # TODO(synk): local_attention_window / use_low_rank_approx not modeled.

        if rng_key is None:
            rng_key = jax.random.PRNGKey(0)
        keys = jax.random.split(rng_key, 8)
        bound = 1.0 / math.sqrt(embed_size)   # PyTorch nn.Linear default init

        def uni(k, shape):
            return jax.random.uniform(k, shape, jnp.float32, -bound, bound)

        # Weights stored PRE-TRANSPOSED (in, out); 1/sqrt(Dh) folded into the Q
        # projection (weights AND bias) so the attention kernel never scales Q.
        scale = 1.0 / math.sqrt(self.head_dim)
        w_q_t, w_k_t, w_v_t, w_o_t = (uni(keys[i], (embed_size, embed_size))
                                      for i in range(4))
        b_q, b_k, b_v, b_o = (uni(keys[4 + i], (embed_size,)) for i in range(4))

        self.w_qkv_t = jnp.stack([w_q_t * scale, w_k_t, w_v_t]).astype(param_dtype)
        self.b_qkv = jnp.stack([b_q * scale, b_k, b_v]).reshape(
            3, 1, embed_size).astype(jnp.float32)
        self.w_out_t = w_o_t.astype(param_dtype)
        self.b_out = b_o.astype(jnp.float32)

    def __call__(self, query, key, value, mask=None):
        B, S, E = query.shape
        cd = self.param_dtype

        if (query is key) and (key is value):
            # True self-attention: one stacked QKV GEMM, activations read once.
            qkv = stacked_linear(query.reshape(B * S, E).astype(cd),
                                 self.w_qkv_t, self.b_qkv)           # (3, M, E)
        else:
            parts = [stacked_linear(t.reshape(B * S, E).astype(cd),
                                    self.w_qkv_t[g:g + 1],
                                    self.b_qkv[g:g + 1])
                     for g, t in enumerate((query, key, value))]
            qkv = jnp.concatenate(parts, axis=0)                     # (3, M, E)

        qkv = qkv.reshape(3, B, S, E)   # free reshape; no head transposes
        # Flash attention with the output projection fused in-kernel.
        # nn.Dropout on the attention output is an eval-mode no-op.
        return pallas_flash_mha(qkv, self.w_out_t, self.b_out, mask,
                                self.num_heads, out_dtype=query.dtype)


# ------------------------------ pure-JAX reference -------------------------- #

def reference_forward(module, query, key, value, mask=None):
    """Pure-JAX (no Pallas) reference with matching precision choices."""
    B, S, E = query.shape
    H, Dh = module.num_heads, module.head_dim
    cd = module.param_dtype

    def proj(x, g):
        y = jnp.dot(x.reshape(B * S, E).astype(cd), module.w_qkv_t[g],
                    preferred_element_type=jnp.float32) + module.b_qkv[g]
        return y.astype(cd).astype(jnp.float32).reshape(B, S, H, Dh)

    q, k, v = proj(query, 0), proj(key, 1), proj(value, 2)
    s = jnp.einsum('bqhd,bkhd->bhqk', q, k)
    if mask is not None:
        if isinstance(mask, str):
            keep = jnp.tril(jnp.ones((S, S), bool))[None, None]
        else:
            keep = (mask != 0)[:, None]
        s = s + jnp.where(keep, 0.0, _MASK_NEG)
    p = jax.nn.softmax(s, axis=-1).astype(cd).astype(jnp.float32)
    ctx = jnp.einsum('bhqk,bkhd->bqhd', p, v).reshape(B * S, E)
    out = jnp.dot(ctx.astype(cd), module.w_out_t,
                  preferred_element_type=jnp.float32) + module.b_out
    return out.reshape(B, S, E).astype(query.dtype)


# -------------------------------- main --------------------------------------- #

if __name__ == "__main__":
    B, S, E, H = 2, 8, 32, 4

    root = jax.random.PRNGKey(0)
    k_mod, k_x, k_k, k_v = jax.random.split(root, 4)
    module = SelfAttention(embed_size=E, num_heads=H, dropout=0.1, rng_key=k_mod)

    x = jax.random.normal(k_x, (B, S, E), jnp.float32)
    key_in = jax.random.normal(k_k, (B, S, E), jnp.float32)
    val_in = jax.random.normal(k_v, (B, S, E), jnp.float32)

    # 1) True self-attention, no mask (fused stacked-QKV projection path).
    out1 = module(x, x, x, mask=None)
    jax.block_until_ready(out1)
    assert out1.shape == (B, S, E) and out1.dtype == jnp.float32
    ref1 = reference_forward(module, x, x, x, mask=None)
    assert bool(jnp.allclose(out1, ref1, atol=3e-2, rtol=3e-2)), \
        float(jnp.max(jnp.abs(out1 - ref1)))

    # 2) Self-attention with an in-kernel causal mask (zero HBM mask bytes).
    out2 = module(x, x, x, mask="causal")
    jax.block_until_ready(out2)
    ref2 = reference_forward(module, x, x, x, mask="causal")
    assert bool(jnp.allclose(out2, ref2, atol=3e-2, rtol=3e-2)), \
        float(jnp.max(jnp.abs(out2 - ref2)))

    # 3) Distinct query/key/value inputs with an explicit (B, S, S) mask
    #    (separate projections + int8-mask kernel variant).
    mask_arr = jnp.broadcast_to(jnp.tril(jnp.ones((S, S), jnp.float32)),
                                (B, S, S))
    out3 = module(x, key_in, val_in, mask=mask_arr)
    jax.block_until_ready(out3)
    ref3 = reference_forward(module, x, key_in, val_in, mask=mask_arr)
    assert bool(jnp.allclose(out3, ref3, atol=3e-2, rtol=3e-2)), \
        float(jnp.max(jnp.abs(out3 - ref3)))

    assert bool(jnp.all(jnp.isfinite(out1)))
    print("KERNEL_OK")
</pallas_src>

<mosaic_0001>
module attributes {stable_mosaic.version = 11 : i64} {
  func.func @_stacked_linear_kernel_noacc(%arg0: i32, %arg1: i32, %arg2: memref<16x32xbf16, #tpu.memory_space<vmem>>, %arg3: memref<3x32x32xbf16, #tpu.memory_space<vmem>>, %arg4: memref<3x1x32xf32, #tpu.memory_space<vmem>>, %arg5: memref<3x16x32xbf16, #tpu.memory_space<vmem>>) attributes {dimension_semantics = [#tpu.dimension_semantics<parallel>, #tpu.dimension_semantics<parallel>], iteration_bounds = array<i64: 1, 1>, scalar_prefetch = 0 : i64, scratch_operands = 0 : i64, tpu.core_type = #tpu.core_type<tc>, window_params = [{transform_indices = @transform_0, window_bounds = array<i64: 16, 32>}, {transform_indices = @transform_1, window_bounds = array<i64: 3, 32, 32>}, {transform_indices = @transform_2, window_bounds = array<i64: 3, 1, 32>}, {transform_indices = @transform_3, window_bounds = array<i64: 3, 16, 32>}]} {
    %c0 = arith.constant 0 : index
    %c0_0 = arith.constant 0 : index
    %0 = vector.load %arg2[%c0, %c0_0] : memref<16x32xbf16, #tpu.memory_space<vmem>>, vector<16x32xbf16>
    %c0_1 = arith.constant 0 : index
    %c0_2 = arith.constant 0 : index
    %c0_3 = arith.constant 0 : index
    %1 = vector.load %arg3[%c0_1, %c0_2, %c0_3] : memref<3x32x32xbf16, #tpu.memory_space<vmem>>, vector<1x32x32xbf16>
    %2 = vector.shape_cast %1 : vector<1x32x32xbf16> to vector<32x32xbf16>
    %cst = arith.constant dense<0.000000e+00> : vector<16x32xf32>
    %3 = tpu.matmul %0, %2, %cst {dimension_numbers = #tpu.dot_dimension_numbers<[1], [0], [0], [1], [0, 0, 1, 1], [], []>} : vector<16x32xbf16>, vector<32x32xbf16>, vector<16x32xf32> -> vector<16x32xf32>
    %c0_4 = arith.constant 0 : index
    %c0_5 = arith.constant 0 : index
    %c0_6 = arith.constant 0 : index
    %4 = vector.load %arg4[%c0_4, %c0_5, %c0_6] : memref<3x1x32xf32, #tpu.memory_space<vmem>>, vector<1x1x32xf32>
    %5 = vector.shape_cast %4 : vector<1x1x32xf32> to vector<1x32xf32>
    %6 = vector.broadcast %5 : vector<1x32xf32> to vector<16x32xf32>
    %7 = arith.addf %3, %6 : vector<16x32xf32>
    %8 = arith.truncf %7 : vector<16x32xf32> to vector<16x32xbf16>
    %c0_7 = arith.constant 0 : index
    %c0_8 = arith.constant 0 : index
    %c0_9 = arith.constant 0 : index
    %9 = vector.load %arg5[%c0_7, %c0_8, %c0_9] : memref<3x16x32xbf16, #tpu.memory_space<vmem>>, vector<1x16x32xbf16>
    %10 = vector.shape_cast %9 : vector<1x16x32xbf16> to vector<16x32xbf16>
    %11 = vector.shape_cast %8 : vector<16x32xbf16> to vector<1x16x32xbf16>
    tpu.vector_store %arg5[%c0_7, %c0_8, %c0_9], %11 {strides = array<i32>} : memref<3x16x32xbf16, #tpu.memory_space<vmem>>, vector<1x16x32xbf16>,
    %c1 = arith.constant 1 : index
    %c0_10 = arith.constant 0 : index
    %c0_11 = arith.constant 0 : index
    %12 = vector.load %arg3[%c1, %c0_10, %c0_11] : memref<3x32x32xbf16, #tpu.memory_space<vmem>>, vector<1x32x32xbf16>
    %13 = vector.shape_cast %12 : vector<1x32x32xbf16> to vector<32x32xbf16>
    %cst_12 = arith.constant dense<0.000000e+00> : vector<16x32xf32>
    %14 = tpu.matmul %0, %13, %cst_12 {dimension_numbers = #tpu.dot_dimension_numbers<[1], [0], [0], [1], [0, 0, 1, 1], [], []>} : vector<16x32xbf16>, vector<32x32xbf16>, vector<16x32xf32> -> vector<16x32xf32>
    %c1_13 = arith.constant 1 : index
    %c0_14 = arith.constant 0 : index
    %c0_15 = arith.constant 0 : index
    %15 = vector.load %arg4[%c1_13, %c0_14, %c0_15] : memref<3x1x32xf32, #tpu.memory_space<vmem>>, vector<1x1x32xf32>
    %16 = vector.shape_cast %15 : vector<1x1x32xf32> to vector<1x32xf32>
    %17 = vector.broadcast %16 : vector<1x32xf32> to vector<16x32xf32>
    %18 = arith.addf %14, %17 : vector<16x32xf32>
    %19 = arith.truncf %18 : vector<16x32xf32> to vector<16x32xbf16>
    %c1_16 = arith.constant 1 : index
    %c0_17 = arith.constant 0 : index
    %c0_18 = arith.constant 0 : index
    %20 = vector.load %arg5[%c1_16, %c0_17, %c0_18] : memref<3x16x32xbf16, #tpu.memory_space<vmem>>, vector<1x16x32xbf16>
    %21 = vector.shape_cast %20 : vector<1x16x32xbf16> to vector<16x32xbf16>
    %22 = vector.shape_cast %19 : vector<16x32xbf16> to vector<1x16x32xbf16>
    tpu.vector_store %arg5[%c1_16, %c0_17, %c0_18], %22 {strides = array<i32>} : memref<3x16x32xbf16, #tpu.memory_space<vmem>>, vector<1x16x32xbf16>,
    %c2 = arith.constant 2 : index
    %c0_19 = arith.constant 0 : index
    %c0_20 = arith.constant 0 : index
    %23 = vector.load %arg3[%c2, %c0_19, %c0_20] : memref<3x32x32xbf16, #tpu.memory_space<vmem>>, vector<1x32x32xbf16>
    %24 = vector.shape_cast %23 : vector<1x32x32xbf16> to vector<32x32xbf16>
    %cst_21 = arith.constant dense<0.000000e+00> : vector<16x32xf32>
    %25 = tpu.matmul %0, %24, %cst_21 {dimension_numbers = #tpu.dot_dimension_numbers<[1], [0], [0], [1], [0, 0, 1, 1], [], []>} : vector<16x32xbf16>, vector<32x32xbf16>, vector<16x32xf32> -> vector<16x32xf32>
    %c2_22 = arith.constant 2 : index
    %c0_23 = arith.constant 0 : index
    %c0_24 = arith.constant 0 : index
    %26 = vector.load %arg4[%c2_22, %c0_23, %c0_24] : memref<3x1x32xf32, #tpu.memory_space<vmem>>, vector<1x1x32xf32>
    %27 = vector.shape_cast %26 : vector<1x1x32xf32> to vector<1x32xf32>
    %28 = vector.broadcast %27 : vector<1x32xf32> to vector<16x32xf32>
    %29 = arith.addf %25, %28 : vector<16x32xf32>
    %30 = arith.truncf %29 : vector<16x32xf32> to vector<16x32xbf16>
    %c2_25 = arith.constant 2 : index
    %c0_26 = arith.constant 0 : index
    %c0_27 = arith.constant 0 : index
    %31 = vector.load %arg5[%c2_25, %c0_26, %c0_27] : memref<3x16x32xbf16, #tpu.memory_space<vmem>>, vector<1x16x32xbf16>
    %32 = vector.shape_cast %31 : vector<1x16x32xbf16> to vector<16x32xbf16>
    %33 = vector.shape_cast %30 : vector<16x32xbf16> to vector<1x16x32xbf16>
    tpu.vector_store %arg5[%c2_25, %c0_26, %c0_27], %33 {strides = array<i32>} : memref<3x16x32xbf16, #tpu.memory_space<vmem>>, vector<1x16x32xbf16>,
    return
  }
  func.func @transform_0(%arg0: i32, %arg1: i32) -> (i32, i32) {
    %c0_i32 = arith.constant 0 : i32
    %c0_i32_0 = arith.constant 0 : i32
    return %arg0, %c0_i32 : i32, i32
  }
  func.func @transform_1(%arg0: i32, %arg1: i32) -> (i32, i32, i32) {
    %c0_i32 = arith.constant 0 : i32
    %c0_i32_0 = arith.constant 0 : i32
    %c0_i32_1 = arith.constant 0 : i32
    return %c0_i32, %c0_i32_0, %arg1 : i32, i32, i32
  }
  func.func @transform_2(%arg0: i32, %arg1: i32) -> (i32, i32, i32) {
    %c0_i32 = arith.constant 0 : i32
    %c0_i32_0 = arith.constant 0 : i32
    %c0_i32_1 = arith.constant 0 : i32
    return %c0_i32, %c0_i32_0, %arg1 : i32, i32, i32
  }
  func.func @transform_3(%arg0: i32, %arg1: i32) -> (i32, i32, i32) {
    %c0_i32 = arith.constant 0 : i32
    %c0_i32_0 = arith.constant 0 : i32
    return %c0_i32, %arg0, %arg1 : i32, i32, i32
  }
}

</mosaic_0001>

<bundles_post_ra>
// kernel: tpu_custom_call.1
= control target key start
LH: loop header
LB: loop body
LE: loop exit
PB: predicated region body
PF: predicated region fallthrough
CT: control target
= control target key end

     0   :  { %8 = vsyncpa [#allocation3], 0  ;;  %s421_s0 = inlined_call_operand.hbm [shape: bf16[16,32], index: 0, kind: input, shape index: {}]   ;;  %s422_s1 = inlined_call_operand.hbm [shape: bf16[3,32,32], index: 1, kind: input, shape index: {}]   ;;  %s423_s2 = inlined_call_operand.hbm [shape: f32[3,1,32], index: 2, kind: input, shape index: {}]   ;;  %s424_s3 = inlined_call_operand.hbm [shape: bf16[3,16,32], index: 3, kind: output, shape index: {}]  }
   0x1   :  { %9 = vsyncpa [#allocation6], 0 }
   0x2   :  { %10 = vsyncpa [#allocation4], 0  ;;  %s28_s14 = sshll.u32 %s422_s1, 4  ;;  %s366_s15 = smov [#allocation5]   ;;  %s29_s14 = int_to_ptr.hbm [resolvable:$true] %s28_s14 }
   0x3   :  { %s30_s16 = sshll.u32 %s366_s15, 4  ;;  %s15_s19 = sshll.u32 %s421_s0, 4  ;;  %s31_s16 = int_to_ptr.vmem [resolvable:$true] %s30_s16  ;;  %s16_s19 = int_to_ptr.hbm [resolvable:$true] %s15_s19 }
   0x4   :  { %s367_s20 = smov 64   ;;  %s368_s21 = smov 4  }
   0x5   :  { %36 = dma.hbm_to_vmem [thread:$0]  %s29_s14, 768, %s31_s16, [#allocation6], %s367_s20, %s367_s20, %s368_s21  }
   0x6   :  { %s369_s22 = smov [#allocation2]   ;;  %s41_s1 = sshll.u32 %s423_s2, 4  ;;  %s42_s1 = int_to_ptr.hbm [resolvable:$true] %s41_s1 }
   0x7   :  { %s17_s23 = sshll.u32 %s369_s22, 4  ;;  %s370_s0 = smov [#allocation7]   ;;  %s18_s23 = int_to_ptr.vmem [resolvable:$true] %s17_s23 }
   0x8   :  { %23 = dma.hbm_to_vmem [thread:$0]  %s16_s19, 128, %s18_s23, [#allocation3], %s367_s20, %s367_s20, %s368_s21  }
   0x9   :  { %s43_s26 = sshll.u32 %s370_s0, 4  ;;  %s371_s27 = smov 16   ;;  %s44_s26 = int_to_ptr.vmem [resolvable:$true] %s43_s26 }
   0xa   :  { %s372_s28 = smov 1  }
   0xb   :  { %49 = dma.hbm_to_vmem [thread:$0]  %s42_s1, 48, %s44_s26, [#allocation6], %s371_s27, %s371_s27, %s372_s28  }
   0xc   :  { %360 = dma.done.wait [#allocation3], 128  }
   0xd   :  { %361 = vsyncadd [#allocation3], 4294967168 }
   0xe   :  { %362 = dma.done.wait [#allocation6], 816  }
   0xf   :  { %363 = vsyncadd [#allocation6], 4294966480  ;;  %v248_v0 = vld [vmem:[#allocation5 + $0x8] sm:$0xff]  ;;  %v250_v1 = vld [vmem:[#allocation5 + $0x18] sm:$0xff]  ;;  %vm90_vm0 = vcmask 261120   ;;  %vm110_vm1 = vcmask 257024  }
  0x10   :  { %v252_v2 = vld [vmem:[#allocation5 + $0x28] sm:$0xff]  ;;  %100 = vmatpush.bf16.msra.mxu0 %v248_v0  ;;  %141 = vmatpush.bf16.msra.mxu1 %v250_v1  ;;  %v247_v3 = vld [vmem:[#allocation5] sm:$0xff]  ;;  %v249_v4 = vld [vmem:[#allocation5 + $0x10] sm:$0xff]  ;;  %s373_s2 = smov [#allocation8]   ;;  %s201_s5 = sshll.u32 %s424_s3, 4  ;;  %s202_s5 = int_to_ptr.hbm [resolvable:$true] %s201_s5 }
  0x11   :  { %182 = vmatpush.bf16.msra.mxu2 %v252_v2  ;;  %v251_v5 = vld [vmem:[#allocation5 + $0x20] sm:$0xff]  ;;  %v246_v6 = vld [vmem:[#allocation2] sm:$0xff]  ;;  %v261_v7 = vld [vmem:[#allocation7] ss:$0 sm:$0xff]  ;;  %s199_s29 = sshll.u32 %s373_s2, 4  ;;  %s200_s29 = int_to_ptr.vmem [resolvable:$true] %s199_s29 }
  0x12   :  { %v262_v8 = vld [vmem:[#allocation7 + $0x1] ss:$0 sm:$0xff]  ;;  %v263_v15 = vld [vmem:[#allocation7 + $0x2] ss:$0 sm:$0xff] }
  0x14   :  { %101 = vmatpush.bf16.msra.mxu0 %v247_v3  ;;  %142 = vmatpush.bf16.msra.mxu1 %v249_v4 }
  0x15   :  { %183 = vmatpush.bf16.msra.mxu2 %v251_v5 }
  0x17   :  { %227 = vmatmul.msk.bf16.vlgmr.msra.gmra.mxu0 %vm90_vm0, %v246_v6  ;;  %236 = vmatmul.msk.bf16.vlgmr.msra.gmra.mxu1 %vm90_vm0, %v246_v6 }
  0x18   :  { %245 = vmatmul.msk.bf16.vlgmr.msra.gmra.mxu2 %vm90_vm0, %v246_v6 }
  0x94   :  { %v103_v9 = vpop.f32.mrf.mxu0  ;;  %v144_v10 = vpop.f32.mrf.mxu1 }
  0x95   :  { %v104_v11 = vadd.f32 %v261_v7, %v103_v9  ;;  %v145_v12 = vadd.f32 %v262_v8, %v144_v10 }
  0x97   :  { %v108_v13 = vpack.c.bf16 %v104_v11, %v104_v11  ;;  %v149_v14 = vpack.c.bf16 %v145_v12, %v145_v12 }
  0x99   :  { %111 = vst.msk [vmem:[#allocation8] sm:$0xf] %vm110_vm1, %v108_v13 }
  0x9a   :  { %152 = vst.msk [vmem:[#allocation8 + $0x8] sm:$0xf] %vm110_vm1, %v149_v14 }
  0x9b   :  { %v185_v16 = vpop.f32.mrf.mxu2 }
  0x9c   :  { %v186_v17 = vadd.f32 %v263_v15, %v185_v16  ;;  %v105_v18 = vpop.f32.mrf.mxu0  ;;  %v146_v19 = vpop.f32.mrf.mxu1 }
  0x9d   :  { %v106_v20 = vadd.f32 %v261_v7, %v105_v18  ;;  %v147_v21 = vadd.f32 %v262_v8, %v146_v19 }
  0x9e   :  { %v190_v22 = vpack.c.bf16 %v186_v17, %v186_v17 }
  0x9f   :  { %v109_v23 = vpack.c.bf16 %v106_v20, %v106_v20  ;;  %v150_v24 = vpack.c.bf16 %v147_v21, %v147_v21 }
  0xa0   :  { %193 = vst.msk [vmem:[#allocation8 + $0x10] sm:$0xf] %vm110_vm1, %v190_v22 }
  0xa1   :  { %112 = vst.msk [vmem:[#allocation8 + $0x4] sm:$0xf] %vm110_vm1, %v109_v23 }
  0xa2   :  { %153 = vst.msk [vmem:[#allocation8 + $0xc] sm:$0xf] %vm110_vm1, %v150_v24 }
  0xa3   :  { %v187_v25 = vpop.f32.mrf.mxu2 }
  0xa4   :  { %v188_v26 = vadd.f32 %v263_v15, %v187_v25 }
  0xa6   :  { %v191_v27 = vpack.c.bf16 %v188_v26, %v188_v26 }
  0xa8   :  { %194 = vst.msk [vmem:[#allocation8 + $0x14] sm:$0xf] %vm110_vm1, %v191_v27 }
  0xa9   :  { %207 = dma.vmem_to_hbm [thread:$0]  %s200_s29, 384, %s202_s5, [#allocation4], %s367_s20, %s367_s20, %s368_s21  }
  0xaa   :  { %364 = dma.done.wait [#allocation4], 384  }
  0xab   :  { %365 = vsyncadd [#allocation4], 4294966912 }
  0xac   :  { %212 = vsyncpa [#allocation3], 1 }
  0xad   :  { %213 = vsyncpa [#allocation6], 1 }
  0xae   :  { %214 = vsyncpa [#allocation4], 1 }

</bundles_post_ra>
